<compile_context>
chip_gen: v6e
topology: v6e:2x2x1
jax: 0.10.0
libtpu: 0.0.40
codegen_flags: <defaults>
</compile_context>

<pallas_src>
import functools

import jax
import jax.numpy as jnp
from jax.experimental import pallas as pl
from jax.experimental.pallas import tpu as pltpu


def _net_kernel(num_layers, d_pad, h1, a_ref, x_ref, w_ref, fc_ref, out_ref):
    """Single-invocation kernel.

    a_ref : (N, N)            normalized adjacency
    x_ref : (N, d_pad)        node features, zero-padded channels
    w_ref : (L, d_pad, d_pad) zero-padded GCN weights, layer-stacked
    fc_ref: (d_pad+1+h1+1, h1) fc11_w | fc11_b | fc12_w(col0) | fc12_b(col0)
    out_ref: (1, 1)
    """
    a = a_ref[...]                       # (N, N)
    h = x_ref[...]                       # (N, d_pad)

    # GCN layers: h <- relu(A_norm @ (h @ W_l)); zero-padded channels stay 0.
    for l in range(num_layers):
        hw = jnp.dot(h, w_ref[l], preferred_element_type=jnp.float32)
        h = jnp.maximum(
            jnp.dot(a, hw, preferred_element_type=jnp.float32), 0.0)

    # output_GNN.sum(axis=0)  -> (1, d_pad); padded cols are exactly zero.
    s = jnp.sum(h, axis=0, keepdims=True)

    fc = fc_ref[...]                                 # (d_pad + 2 + h1, h1)
    w1 = fc[0:d_pad, :]                              # (d_pad, h1) zero-padded
    b1 = fc[d_pad:d_pad + 1, :]                      # (1, h1)
    w2 = fc[d_pad + 1:d_pad + 1 + h1, 0:1]           # (h1, 1)
    b2 = fc[d_pad + 1 + h1:d_pad + 2 + h1, 0:1]      # (1, 1)

    # fc11 + relu
    a1 = jnp.maximum(
        jnp.dot(s, w1, preferred_element_type=jnp.float32) + b1, 0.0)
    # fc12 (final output, shape (1, 1))
    out_ref[...] = jnp.dot(a1, w2, preferred_element_type=jnp.float32) + b2


def net_forward(a_norm, x, gnn_weights, fc11_w, fc11_b, fc12_w, fc12_b):
    """Runs the full Net forward in one Pallas kernel. Returns shape (1,)."""
    num_nodes, c_in = x.shape
    num_layers = len(gnn_weights)
    h1 = fc11_w.shape[1]                 # 16

    # Common channel pad so all GCN weights share one stacked slab.
    dims = [c_in] + [w.shape[0] for w in gnn_weights] + \
           [w.shape[1] for w in gnn_weights]
    d_pad = max(max(dims), 8)
    d_pad = -(-d_pad // 8) * 8           # round up to sublane multiple

    # (N, d_pad) node features, zero-padded channels.
    x_pad = jnp.pad(x.astype(jnp.float32), ((0, 0), (0, d_pad - c_in)))

    # (L, d_pad, d_pad) zero-padded GCN weights.
    w_stack = jnp.stack([
        jnp.pad(w.astype(jnp.float32),
                ((0, d_pad - w.shape[0]), (0, d_pad - w.shape[1])))
        for w in gnn_weights])

    # fc head slab: fc11_w rows, fc11_b row, fc12_w column, fc12_b scalar.
    rows = d_pad + 1 + h1 + 1
    fc_slab = jnp.zeros((rows, h1), jnp.float32)
    fc_slab = fc_slab.at[:fc11_w.shape[0], :].set(fc11_w)
    fc_slab = fc_slab.at[d_pad, :].set(jnp.reshape(fc11_b, (h1,)))
    fc_slab = fc_slab.at[d_pad + 1:d_pad + 1 + h1, 0].set(
        jnp.reshape(fc12_w, (h1,)))
    fc_slab = fc_slab.at[d_pad + 1 + h1, 0].set(jnp.reshape(fc12_b, ())[()])

    kernel = functools.partial(_net_kernel, num_layers, d_pad, h1)

    vmem_spec = pl.BlockSpec(memory_space=pltpu.MemorySpace.VMEM)
    out = pl.pallas_call(
        kernel,
        out_shape=jax.ShapeDtypeStruct((1, 1), jnp.float32),
        in_specs=[vmem_spec] * 4,
        out_specs=vmem_spec,
    )(a_norm.astype(jnp.float32), x_pad, w_stack, fc_slab)
    return out.reshape((1,))


def build_gcn_adjacency(edge_index, num_nodes):
    """Dense symmetric-normalized adjacency, PyG GCNConv gcn_norm semantics:
    duplicate edges scatter-ADD, and a unit self-loop is added on top."""
    src, dst = edge_index
    adj = jnp.zeros((num_nodes, num_nodes), jnp.float32)
    # message passing j -> i : A[i, j] += 1 (duplicates accumulate, as in PyG)
    adj = adj.at[dst, src].add(1.0)
    # add self loops on top of any existing ones
    adj = adj + jnp.eye(num_nodes, dtype=jnp.float32)
    deg = jnp.sum(adj, axis=1)                       # (N,)
    d_inv_sqrt = jnp.where(deg > 0, jax.lax.rsqrt(deg), 0.0)
    return adj * d_inv_sqrt[:, None] * d_inv_sqrt[None, :]


if __name__ == "__main__":
    # Small, deterministic configuration consistent with the module:
    #   c_in=14, c_hidden=num_nodes, c_out=32, num_layers GCN layers,
    #   fc11: Linear(32, 16), fc12: Linear(16, 1)
    num_nodes = 8
    num_layers = 3
    c_in, c_hidden, c_out = 14, num_nodes, 32

    key = jax.random.PRNGKey(0)
    k_x, k_e, k_w = jax.random.split(key, 3)

    # Node features (N, c_in)
    x = jax.random.normal(k_x, (num_nodes, c_in), jnp.float32)

    # Random directed edge list (2, E)
    num_edges = 16
    k_src, k_dst = jax.random.split(k_e)
    src = jax.random.randint(k_src, (num_edges,), 0, num_nodes)
    dst = jax.random.randint(k_dst, (num_edges,), 0, num_nodes)
    edge_index = jnp.stack([src, dst], axis=0)

    a_norm = build_gcn_adjacency(edge_index, num_nodes)

    # GCN layer weights (stored as (in, out), applied as h @ W), bias=False.
    dims = [c_in] + [c_hidden] * (num_layers - 1) + [c_out]
    gnn_weights = []
    wkeys = jax.random.split(k_w, num_layers + 2)
    for l in range(num_layers):
        fan_in, fan_out = dims[l], dims[l + 1]
        scale = 1.0 / jnp.sqrt(jnp.float32(fan_in))
        gnn_weights.append(
            scale * jax.random.normal(wkeys[l], (fan_in, fan_out), jnp.float32))

    # fc11: Linear(32, 16); fc12: Linear(16, 1) — pre-transposed to (in, out).
    fc11_w = (1.0 / jnp.sqrt(32.0)) * jax.random.normal(
        wkeys[num_layers], (32, 16), jnp.float32)
    fc11_b = jnp.zeros((16,), jnp.float32)
    fc12_w = (1.0 / jnp.sqrt(16.0)) * jax.random.normal(
        wkeys[num_layers + 1], (16, 1), jnp.float32)
    fc12_b = jnp.zeros((1,), jnp.float32)

    out = net_forward(a_norm, x, gnn_weights, fc11_w, fc11_b, fc12_w, fc12_b)
    out = jax.block_until_ready(out)

    # Pure-JAX reference for a sanity check.
    h = x
    for w in gnn_weights:
        h = jnp.maximum(a_norm @ (h @ w), 0.0)
    s = h.sum(axis=0)
    a1 = jnp.maximum(s @ fc11_w + fc11_b, 0.0)
    ref = a1 @ fc12_w + fc12_b
    assert jnp.allclose(out, ref, atol=1e-4, rtol=1e-4), (out, ref)

    print("KERNEL_OK")
</pallas_src>

<mosaic_0001>
module attributes {stable_mosaic.version = 11 : i64} {
  func.func @_net_kernel(%arg0: memref<8x8xf32, #tpu.memory_space<vmem>>, %arg1: memref<8x32xf32, #tpu.memory_space<vmem>>, %arg2: memref<3x32x32xf32, #tpu.memory_space<vmem>>, %arg3: memref<50x16xf32, #tpu.memory_space<vmem>>, %arg4: memref<1x1xf32, #tpu.memory_space<vmem>>) attributes {dimension_semantics = [], scalar_prefetch = 0 : i64, scratch_operands = 0 : i64, tpu.core_type = #tpu.core_type<tc>} {
    %c0 = arith.constant 0 : index
    %c0_0 = arith.constant 0 : index
    %0 = vector.load %arg0[%c0, %c0_0] : memref<8x8xf32, #tpu.memory_space<vmem>>, vector<8x8xf32>
    %c0_1 = arith.constant 0 : index
    %c0_2 = arith.constant 0 : index
    %1 = vector.load %arg1[%c0_1, %c0_2] : memref<8x32xf32, #tpu.memory_space<vmem>>, vector<8x32xf32>
    %c0_3 = arith.constant 0 : index
    %c0_4 = arith.constant 0 : index
    %c0_5 = arith.constant 0 : index
    %2 = vector.load %arg2[%c0_3, %c0_4, %c0_5] : memref<3x32x32xf32, #tpu.memory_space<vmem>>, vector<1x32x32xf32>
    %3 = vector.shape_cast %2 : vector<1x32x32xf32> to vector<32x32xf32>
    %cst = arith.constant dense<0.000000e+00> : vector<8x32xf32>
    %4 = tpu.matmul %1, %3, %cst {dimension_numbers = #tpu.dot_dimension_numbers<[1], [0], [0], [1], [0, 0, 1, 1], [], []>} : vector<8x32xf32>, vector<32x32xf32>, vector<8x32xf32> -> vector<8x32xf32>
    %cst_6 = arith.constant dense<0.000000e+00> : vector<8x32xf32>
    %5 = tpu.matmul %0, %4, %cst_6 {dimension_numbers = #tpu.dot_dimension_numbers<[1], [0], [0], [1], [0, 0, 1, 1], [], []>} : vector<8x8xf32>, vector<8x32xf32>, vector<8x32xf32> -> vector<8x32xf32>
    %cst_7 = arith.constant 0.000000e+00 : f32
    %6 = vector.broadcast %cst_7 : f32 to vector<8x32xf32>
    %7 = arith.maximumf %5, %6 : vector<8x32xf32>
    %c1 = arith.constant 1 : index
    %c0_8 = arith.constant 0 : index
    %c0_9 = arith.constant 0 : index
    %8 = vector.load %arg2[%c1, %c0_8, %c0_9] : memref<3x32x32xf32, #tpu.memory_space<vmem>>, vector<1x32x32xf32>
    %9 = vector.shape_cast %8 : vector<1x32x32xf32> to vector<32x32xf32>
    %cst_10 = arith.constant dense<0.000000e+00> : vector<8x32xf32>
    %10 = tpu.matmul %7, %9, %cst_10 {dimension_numbers = #tpu.dot_dimension_numbers<[1], [0], [0], [1], [0, 0, 1, 1], [], []>} : vector<8x32xf32>, vector<32x32xf32>, vector<8x32xf32> -> vector<8x32xf32>
    %cst_11 = arith.constant dense<0.000000e+00> : vector<8x32xf32>
    %11 = tpu.matmul %0, %10, %cst_11 {dimension_numbers = #tpu.dot_dimension_numbers<[1], [0], [0], [1], [0, 0, 1, 1], [], []>} : vector<8x8xf32>, vector<8x32xf32>, vector<8x32xf32> -> vector<8x32xf32>
    %cst_12 = arith.constant 0.000000e+00 : f32
    %12 = vector.broadcast %cst_12 : f32 to vector<8x32xf32>
    %13 = arith.maximumf %11, %12 : vector<8x32xf32>
    %c2 = arith.constant 2 : index
    %c0_13 = arith.constant 0 : index
    %c0_14 = arith.constant 0 : index
    %14 = vector.load %arg2[%c2, %c0_13, %c0_14] : memref<3x32x32xf32, #tpu.memory_space<vmem>>, vector<1x32x32xf32>
    %15 = vector.shape_cast %14 : vector<1x32x32xf32> to vector<32x32xf32>
    %cst_15 = arith.constant dense<0.000000e+00> : vector<8x32xf32>
    %16 = tpu.matmul %13, %15, %cst_15 {dimension_numbers = #tpu.dot_dimension_numbers<[1], [0], [0], [1], [0, 0, 1, 1], [], []>} : vector<8x32xf32>, vector<32x32xf32>, vector<8x32xf32> -> vector<8x32xf32>
    %cst_16 = arith.constant dense<0.000000e+00> : vector<8x32xf32>
    %17 = tpu.matmul %0, %16, %cst_16 {dimension_numbers = #tpu.dot_dimension_numbers<[1], [0], [0], [1], [0, 0, 1, 1], [], []>} : vector<8x8xf32>, vector<8x32xf32>, vector<8x32xf32> -> vector<8x32xf32>
    %cst_17 = arith.constant 0.000000e+00 : f32
    %18 = vector.broadcast %cst_17 : f32 to vector<8x32xf32>
    %19 = arith.maximumf %17, %18 : vector<8x32xf32>
    %cst_18 = arith.constant dense<0.000000e+00> : vector<32xf32>
    %20 = vector.multi_reduction <add>, %19, %cst_18 [0] : vector<8x32xf32> to vector<32xf32>
    %21 = vector.shape_cast %20 : vector<32xf32> to vector<1x32xf32>
    %c0_19 = arith.constant 0 : index
    %c0_20 = arith.constant 0 : index
    %22 = vector.load %arg3[%c0_19, %c0_20] : memref<50x16xf32, #tpu.memory_space<vmem>>, vector<50x16xf32>
    %23 = vector.extract_strided_slice %22 {offsets = [0, 0], sizes = [32, 16], strides = [1, 1]} : vector<50x16xf32> to vector<32x16xf32>
    %24 = vector.extract_strided_slice %22 {offsets = [32, 0], sizes = [1, 16], strides = [1, 1]} : vector<50x16xf32> to vector<1x16xf32>
    %25 = vector.extract_strided_slice %22 {offsets = [33, 0], sizes = [16, 1], strides = [1, 1]} : vector<50x16xf32> to vector<16x1xf32>
    %26 = vector.extract_strided_slice %22 {offsets = [49, 0], sizes = [1, 1], strides = [1, 1]} : vector<50x16xf32> to vector<1x1xf32>
    %cst_21 = arith.constant dense<0.000000e+00> : vector<1x16xf32>
    %27 = tpu.matmul %21, %23, %cst_21 {dimension_numbers = #tpu.dot_dimension_numbers<[1], [0], [0], [1], [0, 0, 1, 1], [], []>} : vector<1x32xf32>, vector<32x16xf32>, vector<1x16xf32> -> vector<1x16xf32>
    %28 = arith.addf %27, %24 : vector<1x16xf32>
    %cst_22 = arith.constant 0.000000e+00 : f32
    %29 = vector.broadcast %cst_22 : f32 to vector<1x16xf32>
    %30 = arith.maximumf %28, %29 : vector<1x16xf32>
    %cst_23 = arith.constant dense<0.000000e+00> : vector<1x1xf32>
    %31 = tpu.matmul %30, %25, %cst_23 {dimension_numbers = #tpu.dot_dimension_numbers<[1], [0], [0], [1], [0, 0, 1, 1], [], []>} : vector<1x16xf32>, vector<16x1xf32>, vector<1x1xf32> -> vector<1x1xf32>
    %32 = arith.addf %31, %26 : vector<1x1xf32>
    %c0_24 = arith.constant 0 : index
    %c0_25 = arith.constant 0 : index
    %33 = vector.load %arg4[%c0_24, %c0_25] : memref<1x1xf32, #tpu.memory_space<vmem>>, vector<1x1xf32>
    tpu.vector_store %arg4[%c0_24, %c0_25], %32 {strides = array<i32>} : memref<1x1xf32, #tpu.memory_space<vmem>>, vector<1x1xf32>,
    return
  }
}

</mosaic_0001>

<bundles_post_ra>
// kernel: tpu_custom_call.1
= control target key start
LH: loop header
LB: loop body
LE: loop exit
PB: predicated region body
PF: predicated region fallthrough
CT: control target
= control target key end

     0   :  { %9 = vsyncpa [#allocation3], 0  ;;  %s938_s0 = inlined_call_operand.vmem [shape: f32[8,8], index: 0, kind: input, shape index: {}]   ;;  %s939_s1 = inlined_call_operand.vmem [shape: f32[8,32], index: 1, kind: input, shape index: {}]   ;;  %s940_s2 = inlined_call_operand.hbm [shape: f32[3,32,32], index: 2, kind: input, shape index: {}]   ;;  %s941_s3 = inlined_call_operand.vmem [shape: f32[50,16], index: 3, kind: input, shape index: {}]   ;;  %s942_s4 = inlined_call_operand.hbm [shape: f32[1,1], index: 4, kind: output, shape index: {}]  }
   0x1   :  { %10 = vsyncpa [#allocation4], 0  ;;  %s829_s15 = smov [#allocation2]  }
   0x2   :  { %s20_s16 = sshll.u32 %s829_s15, 4  ;;  %s21_s16 = int_to_ptr.vmem [resolvable:$true] %s20_s16 }
   0x3   :  { %s793_s17 = scalar_lea.vmem %s21_s16, 1536  ;;  %p798_p1 = scmp.lt.s32.totalorder %s21_s16, %s21_s16 }
   0x4   :  { %p794_p0 = scmp.ne.s32.totalorder %s21_s16, %s793_s17  ;;  %p799_p2 = scmp.lt.s32.totalorder %s793_s17, %s793_s17 }
   0x6   :  { %p800_p3 = por %p799_p2, %p798_p1 }
   0x8   :  { %p801_p4 = pnand %p800_p3, %p794_p0 }
   0xa   :  { %804 = shalt.err (!%p801_p4)
}
   0xb   :  { %s830_s18 = smov 128   ;;  %s831_s19 = smov 8  }
   0xc   :  { %26 = dma.hbm_to_vmem [thread:$0]  %s940_s2, 1536, %s21_s16, [#allocation3], %s830_s18, %s830_s18, %s831_s19  }
   0xd   :  { %825 = dma.done.wait [#allocation3], 1536  }
   0xe   :  { %826 = vsyncadd [#allocation3], 4294965760  ;;  %v832_v0 = vmov 0.0   ;;  %vm833_vm0 = vmmov 0   ;;  %v37_v1 = vld [vmem:[#allocation2 + $0x18] sm:$0xff]  ;;  %v36_v2 = vld [vmem:[#allocation2 + $0x10] sm:$0xff] }
   0xf   :  { %713 = vmatprep.subr.mxu0 %v832_v0  ;;  %721 = vmatprep.mubr.msk.f32.mxu0 %vm833_vm0, %v832_v0  ;;  %v35_v3 = vld [vmem:[#allocation2 + $0x8] sm:$0xff]  ;;  %v34_v4 = vld [vmem:[#allocation2] sm:$0xff]  ;;  %vm38_vm1 = vcmask 261120   ;;  %vm112_vm2 = vcmask 64512   ;;  %v191_v8 = vld [vmem:[#allocation2 + $0x38] sm:$0xff]  ;;  %vm576_vm3 = vcmask 1046528  }
  0x10   :  { %724 = vmatprep.subr.mxu1 %v832_v0  ;;  %726 = vmatprep.mubr.msk.f32.mxu1 %vm833_vm0, %v832_v0  ;;  %v33_v5 = vld [vmem:[%s939_s1] sm:$0xff]  ;;  %v190_v10 = vld [vmem:[#allocation2 + $0x30] sm:$0xff]  ;;  %v189_v11 = vld [vmem:[#allocation2 + $0x28] sm:$0xff]  ;;  %vm585_vm4 = vcmask 130048   ;;  %s834_s11 = smov [#allocation5]   ;;  %vm659_vm5 = vcmask 0  }
  0x11   :  { %714 = vmatpush3.msra.mxu0 %v37_v1  ;;  %v32_v6 = vld [vmem:[%s938_s0] sm:$0xff]  ;;  %v340_v16 = vld [vmem:[#allocation2 + $0x58] sm:$0xff]  ;;  %v339_v17 = vld [vmem:[#allocation2 + $0x50] sm:$0xff]  ;;  %s667_s12 = sshll.u32 %s834_s11, 4  ;;  %s668_s12 = int_to_ptr.vmem [resolvable:$true] %s667_s12 }
  0x12   :  { %715 = vmatprep.subr.mxu0 %v832_v0  ;;  %v188_v12 = vld [vmem:[#allocation2 + $0x20] sm:$0xff]  ;;  %v338_v20 = vld [vmem:[#allocation2 + $0x48] sm:$0xff]  ;;  %v495_v27 = vld [vmem:[%s941_s3 + $0x18] sm:$0xff]  ;;  %s809_s13 = scalar_lea.vmem %s668_s12, 32  ;;  %p810_p6 = scmp.lt.s32.totalorder %s668_s12, %s668_s12 }
  0x13   :  { %716 = vmatpush3.msra.mxu0 %v36_v2  ;;  %v337_v21 = vld [vmem:[#allocation2 + $0x40] sm:$0xff]  ;;  %v494_v28 = vld [vmem:[%s941_s3 + $0x10] sm:$0xff]  ;;  %v493_v29 = vld [vmem:[%s941_s3 + $0x8] sm:$0xff] }
  0x14   :  { %717 = vmatprep.subr.mxu0 %v832_v0  ;;  %v492_v30 = vld [vmem:[%s941_s3] sm:$0xff]  ;;  %v497_v42 = vld [vmem:[%s941_s3 + $0x28] sm:$0xff]  ;;  %v498_v43 = vld [vmem:[%s941_s3 + $0x30] sm:$0x3] }
  0x15   :  { %718 = vmatpush3.msra.mxu0 %v35_v3  ;;  %v496_v41 = vld [vmem:[%s941_s3 + $0x20] sm:$0xff]  ;;  %v578_v44 = vrot.slane %v497_v42, 1  ;;  %v580_v45 = vrot.slane %v498_v43, 1  ;;  %s805_s3 = scalar_lea.vmem %s668_s12, 16 }
  0x16   :  { %719 = vmatprep.subr.mxu0 %v832_v0  ;;  %v577_v46 = vrot.slane %v496_v41, 1  ;;  %p806_p5 = scmp.ne.s32.totalorder %s668_s12, %s805_s3  ;;  %p811_p7 = scmp.lt.s32.totalorder %s809_s13, %s805_s3 }
  0x17   :  { %720 = vmatpush3.msra.mxu0 %v34_v4  ;;  %v581_v47 = vsel %vm576_vm3, %v578_v44, %v580_v45 }
  0x18   :  { %722 = vmatmul.mubr.msk.f32.vlgmr.msra.gmra.mxu0 %vm38_vm1, %v33_v5  ;;  %740 = vmatprep.subr.mxu0 %v832_v0  ;;  %v579_v48 = vsel %vm576_vm3, %v577_v46, %v578_v44  ;;  %p812_p8 = por %p811_p7, %p810_p6 }
  0x19   :  { %742 = vmatprep.mubr.msk.f32.mxu0 %vm833_vm0, %v832_v0 }
  0x1a   :  { %p813_p9 = pnand %p812_p8, %p806_p5 }
  0xd8   :  { %v108_v7 = vpop.f32.mrf.mxu0 }
  0xd9   :  { %725 = vmatpush3.msra.mxu1 %v108_v7 }
  0xda   :  { %v723_v9 = vpop.f32.mrf.mxu0  ;;  %727 = vmatmul.mubr.msk.f32.vlgmr.msra.gmra.mxu1 %vm112_vm2, %v32_v6  ;;  %729 = vmatprep.subr.mxu1 %v832_v0 }
  0xdb   :  { %730 = vmatpush3.msra.mxu1 %v191_v8  ;;  %737 = vmatprep.mubr.msk.f32.mxu1 %vm833_vm0, %v832_v0 }
  0xdc   :  { %731 = vmatprep.subr.mxu1 %v832_v0 }
  0xdd   :  { %732 = vmatpush3.msra.mxu1 %v190_v10 }
  0xde   :  { %733 = vmatprep.subr.mxu1 %v832_v0 }
  0xdf   :  { %734 = vmatpush3.msra.mxu1 %v189_v11 }
  0xe0   :  { %735 = vmatprep.subr.mxu1 %v832_v0 }
  0xe1   :  { %736 = vmatpush3.msra.mxu1 %v188_v12 }
  0xe2   :  { %745 = vmatprep.subr.mxu1 %v832_v0 }
 0x19a   :  { %v182_v13 = vpop.f32.mrf.mxu1 }
 0x19b   :  { %v186_v14 = vmax.f32 %v182_v13, 0.0 }
 0x19c   :  { %v728_v15 = vpop.f32.mrf.mxu1 }
 0x19d   :  { %738 = vmatmul.mubr.msk.f32.vlgmr.msra.gmra.mxu1 %vm38_vm1, %v186_v14 }
 0x19e   :  { %753 = vmatprep.mubr.msk.f32.mxu1 %vm833_vm0, %v832_v0  ;;  %746 = vmatpush3.msra.mxu1 %v340_v16 }
 0x19f   :  { %747 = vmatprep.subr.mxu1 %v832_v0 }
 0x1a0   :  { %748 = vmatpush3.msra.mxu1 %v339_v17 }
 0x1a1   :  { %749 = vmatprep.subr.mxu1 %v832_v0 }
 0x1a2   :  { %750 = vmatpush3.msra.mxu1 %v338_v20 }
 0x1a3   :  { %751 = vmatprep.subr.mxu1 %v832_v0 }
 0x1a4   :  { %752 = vmatpush3.msra.mxu1 %v337_v21 }
 0x1a5   :  { %772 = vmatprep.subr.mxu1 %v832_v0 }
 0x25d   :  { %v261_v18 = vpop.f32.mrf.mxu1 }
 0x25e   :  { %741 = vmatpush3.msra.mxu0 %v261_v18 }
 0x25f   :  { %v739_v19 = vpop.f32.mrf.mxu1  ;;  %743 = vmatmul.mubr.msk.f32.vlgmr.msra.gmra.mxu0 %vm112_vm2, %v32_v6  ;;  %756 = vmatprep.subr.mxu0 %v832_v0 }
 0x260   :  { %758 = vmatprep.mubr.msk.f32.mxu0 %vm833_vm0, %v832_v0 }
 0x31f   :  { %v331_v22 = vpop.f32.mrf.mxu0 }
 0x320   :  { %v335_v23 = vmax.f32 %v331_v22, 0.0 }
 0x321   :  { %v744_v24 = vpop.f32.mrf.mxu0 }
 0x322   :  { %754 = vmatmul.mubr.msk.f32.vlgmr.msra.gmra.mxu1 %vm38_vm1, %v335_v23 }
 0x323   :  { %776 = vmatprep.mubr.msk.f32.mxu1 %vm833_vm0, %v832_v0  ;;  %773 = vmatpush3.msra.mxu1 %v581_v47 }
 0x324   :  { %774 = vmatprep.subr.mxu1 %v832_v0 }
 0x325   :  { %775 = vmatpush3.msra.mxu1 %v579_v48 }
 0x3e2   :  { %v410_v25 = vpop.f32.mrf.mxu1 }
 0x3e3   :  { %757 = vmatpush3.msra.mxu0 %v410_v25 }
 0x3e4   :  { %v755_v26 = vpop.f32.mrf.mxu1  ;;  %759 = vmatmul.mubr.msk.f32.vlgmr.msra.gmra.mxu0 %vm112_vm2, %v32_v6  ;;  %761 = vmatprep.subr.mxu0 %v832_v0 }
 0x3e5   :  { %769 = vmatprep.mubr.msk.f32.mxu0 %vm833_vm0, %v832_v0  ;;  %762 = vmatpush3.msra.mxu0 %v495_v27 }
 0x3e6   :  { %763 = vmatprep.subr.mxu0 %v832_v0 }
 0x3e7   :  { %764 = vmatpush3.msra.mxu0 %v494_v28 }
 0x3e8   :  { %765 = vmatprep.subr.mxu0 %v832_v0 }
 0x3e9   :  { %766 = vmatpush3.msra.mxu0 %v493_v29 }
 0x3ea   :  { %767 = vmatprep.subr.mxu0 %v832_v0 }
 0x3eb   :  { %768 = vmatpush3.msra.mxu0 %v492_v30 }
 0x4a4   :  { %v480_v31 = vpop.f32.mrf.mxu0 }
 0x4a5   :  { %v484_v32 = vmax.f32 %v480_v31, 0.0 }
 0x4a6   :  { %v760_v33 = vpop.f32.mrf.mxu0 }
 0x4a7   :  { %v485_v34 = vsel %vm38_vm1, %v484_v32, 0.0 }
 0x4a8   :  { %v486_v35 = vrot.slane %v485_v34, 4 }
 0x4aa   :  { %v487_v36 = vadd.f32 %v486_v35, %v485_v34 }
 0x4ac   :  { %v488_v37 = vrot.slane %v487_v36, 2 }
 0x4ae   :  { %v489_v38 = vadd.f32 %v488_v37, %v487_v36 }
 0x4b0   :  { %v490_v39 = vrot.slane %v489_v38, 1 }
 0x4b2   :  { %v491_v40 = vadd.f32 %v490_v39, %v489_v38 }
 0x4b4   :  { %770 = vmatmul.mubr.msk.f32.vlgmr.msra.gmra.mxu0 %vm38_vm1, %v491_v40 }
 0x574   :  { %v568_v49 = vpop.f32.mrf.mxu0 }
 0x575   :  { %v569_v50 = vadd.f32 %v568_v49, %v496_v41 }
 0x576   :  { %v771_v51 = vpop.f32.mrf.mxu0 }
 0x577   :  { %v572_v52 = vmax.f32 %v569_v50, 0.0 }
 0x579   :  { %777 = vmatmul.mubr.msk.f32.vlgmr.msra.gmra.mxu1 %vm585_vm4, %v572_v52 }
 0x639   :  { %v655_v53 = vpop.f32.mrf.mxu1 }
 0x63a   :  { %v656_v54 = vadd.f32 %v655_v53, %v580_v45 }
 0x63b   :  { %v778_v55 = vpop.f32.mrf.mxu1 }
 0x63c   :  { %660 = vst.msk [vmem:[#allocation5] sm:$0x1] %vm659_vm5, %v656_v54 }
 0x63d   :  { %816 = shalt.err (!%p813_p9)
}
 0x63e   :  { %670 = dma.vmem_to_hbm [thread:$0]  %s668_s12, 16, %s942_s4, [#allocation4]  }
 0x63f   :  { %827 = dma.done.wait [#allocation4], 16  }
 0x640   :  { %828 = vsyncadd [#allocation4], 4294967280 }
 0x641   :  { %674 = vsyncpa [#allocation3], 1 }
 0x642   :  { %675 = vsyncpa [#allocation4], 1 }

</bundles_post_ra>
